<compile_context>
chip_gen: v7x
topology: tpu7x:2x2x1
jax: 0.10.0
libtpu: 0.0.40
codegen_flags: <defaults>
</compile_context>

<pallas_src>
import functools

import jax
import jax.numpy as jnp
from jax.experimental import pallas as pl
from jax.experimental.pallas import tpu as pltpu


HIDDEN = 56


# ----------------------------------------------------------------------------
# Deterministic parameter init (mirrors layer_init: orthogonal weight * std,
# bias = 0). Exact values differ from torch RNG, but shapes/semantics match.
# Weights are kept in torch (out_dim, in_dim) layout; biases as column vectors
# so they broadcast across the lane (batch) axis inside the kernel.
# ----------------------------------------------------------------------------
def orthogonal_init(key, out_dim, in_dim, gain):
    a = jax.random.normal(key, (out_dim, in_dim), dtype=jnp.float32)
    if out_dim < in_dim:
        a = a.T
    q, r = jnp.linalg.qr(a)
    # sign correction (same convention as torch.nn.init.orthogonal_)
    q = q * jnp.sign(jnp.diag(r))[None, :]
    if out_dim < in_dim:
        q = q.T
    return gain * q  # (out_dim, in_dim)


def make_sampler_params(key, n, hidden=HIDDEN):
    k1, k2, k3 = jax.random.split(key, 3)
    std = float(jnp.sqrt(2.0))
    return dict(
        w1=orthogonal_init(k1, hidden, n, std),        # (H, N)
        b1=jnp.zeros((hidden, 1), jnp.float32),        # (H, 1)
        w2=orthogonal_init(k2, hidden, hidden, std),   # (H, H)
        b2=jnp.zeros((hidden, 1), jnp.float32),        # (H, 1)
        w3=orthogonal_init(k3, n, hidden, 0.01),       # (N, H)
        b3=jnp.zeros((n, 1), jnp.float32),             # (N, 1)
    )


# ----------------------------------------------------------------------------
# Pallas kernel: 3 MXU matmuls + bias add + tanh, batch on the lane axis.
# All operands live in VMEM; intermediates are (H, tile_b) / (N, tile_b),
# i.e. lane-dense.
# ----------------------------------------------------------------------------
def sampler_mlp_kernel(xt_ref, w1_ref, b1_ref, w2_ref, b2_ref, w3_ref, b3_ref,
                       ot_ref):
    xt = xt_ref[...]                                              # (N, tb)
    h1 = jnp.tanh(
        jnp.dot(w1_ref[...], xt, preferred_element_type=jnp.float32)
        + b1_ref[...])                                            # (H, tb)
    h2 = jnp.tanh(
        jnp.dot(w2_ref[...], h1, preferred_element_type=jnp.float32)
        + b2_ref[...])                                            # (H, tb)
    out = (jnp.dot(w3_ref[...], h2, preferred_element_type=jnp.float32)
           + b3_ref[...])                                         # (N, tb)
    ot_ref[...] = out.astype(ot_ref.dtype)


@functools.partial(jax.jit, static_argnames=("tile_b",))
def sampler_forward_pallas(x, params, tile_b=512):
    """x: (B, N) float32 -> (B, N) float32."""
    B, N = x.shape
    H = params["w1"].shape[0]

    # Pick a legal, lane-dense batch tile.
    if tile_b >= B:
        tile_b = B                                  # single block == full dim
    else:
        tile_b = max(128, (tile_b // 128) * 128)    # multiple of 128 lanes
        if tile_b >= B:
            tile_b = B

    xt = x.T                                        # (N, B): batch on lanes
    grid = (pl.cdiv(B, tile_b),)

    # Full-block, constant index_map => fetched once, resident across steps.
    full = lambda shape: pl.BlockSpec(shape, lambda i: (0, 0))

    out_t = pl.pallas_call(
        sampler_mlp_kernel,
        out_shape=jax.ShapeDtypeStruct((N, B), x.dtype),
        grid_spec=pltpu.PrefetchScalarGridSpec(
            num_scalar_prefetch=0,
            grid=grid,
            in_specs=[
                pl.BlockSpec((N, tile_b), lambda i: (0, i)),  # x^T batch-tiled
                full((H, N)),   # w1
                full((H, 1)),   # b1
                full((H, H)),   # w2
                full((H, 1)),   # b2
                full((N, H)),   # w3
                full((N, 1)),   # b3
            ],
            out_specs=pl.BlockSpec((N, tile_b), lambda i: (0, i)),
        ),
        compiler_params=pltpu.CompilerParams(
            dimension_semantics=("parallel",)),
    )(xt, params["w1"], params["b1"], params["w2"], params["b2"],
      params["w3"], params["b3"])

    return out_t.T                                  # back to (B, N)


def sampler_forward_ref(x, params):
    h1 = jnp.tanh(x @ params["w1"].T + params["b1"].T)
    h2 = jnp.tanh(h1 @ params["w2"].T + params["b2"].T)
    return h2 @ params["w3"].T + params["b3"].T


def sampler_forward(x, params, tile_b=512, min_pallas_batch=128):
    """Dispatch: tiny batches are cheaper as fused XLA ops than a pallas_call."""
    if x.shape[0] < min_pallas_batch:
        return sampler_forward_ref(x, params)
    return sampler_forward_pallas(x, params, tile_b=tile_b)


if __name__ == "__main__":
    key = jax.random.PRNGKey(0)
    k_param, k_x = jax.random.split(key)

    N = 8        # action-space size for the Sampler
    B = 256      # batch large enough to exercise the lane-dense kernel path
    params = make_sampler_params(k_param, N)
    x = jax.random.normal(k_x, (B, N), dtype=jnp.float32)

    # tile_b=128 -> grid=(2,): >=2 parallel steps (uses both TCs on v7x).
    out = sampler_forward_pallas(x, params, tile_b=128)
    out = jax.block_until_ready(out)

    ref = sampler_forward_ref(x, params)
    assert out.shape == (B, N)
    assert jnp.allclose(out, ref, atol=5e-5, rtol=5e-5), "mismatch vs reference"

    print("KERNEL_OK")
</pallas_src>

<mosaic_0001>
module attributes {stable_mosaic.version = 11 : i64} {
  func.func @sampler_mlp_kernel(%arg0: i32, %arg1: memref<8x128xf32, #tpu.memory_space<vmem>>, %arg2: memref<56x8xf32, #tpu.memory_space<vmem>>, %arg3: memref<56x1xf32, #tpu.memory_space<vmem>>, %arg4: memref<56x56xf32, #tpu.memory_space<vmem>>, %arg5: memref<56x1xf32, #tpu.memory_space<vmem>>, %arg6: memref<8x56xf32, #tpu.memory_space<vmem>>, %arg7: memref<8x1xf32, #tpu.memory_space<vmem>>, %arg8: memref<8x128xf32, #tpu.memory_space<vmem>>) attributes {dimension_semantics = [#tpu.dimension_semantics<parallel>], iteration_bounds = array<i64: 2>, scalar_prefetch = 0 : i64, scratch_operands = 0 : i64, tpu.core_type = #tpu.core_type<tc>, window_params = [{transform_indices = @transform_0, window_bounds = array<i64: 8, 128>}, {pipeline_mode = #tpu.pipeline_mode<synchronous>, transform_indices = @transform_1, window_bounds = array<i64: 56, 8>}, {pipeline_mode = #tpu.pipeline_mode<synchronous>, transform_indices = @transform_2, window_bounds = array<i64: 56, 1>}, {pipeline_mode = #tpu.pipeline_mode<synchronous>, transform_indices = @transform_3, window_bounds = array<i64: 56, 56>}, {pipeline_mode = #tpu.pipeline_mode<synchronous>, transform_indices = @transform_4, window_bounds = array<i64: 56, 1>}, {pipeline_mode = #tpu.pipeline_mode<synchronous>, transform_indices = @transform_5, window_bounds = array<i64: 8, 56>}, {pipeline_mode = #tpu.pipeline_mode<synchronous>, transform_indices = @transform_6, window_bounds = array<i64: 8, 1>}, {transform_indices = @transform_7, window_bounds = array<i64: 8, 128>}]} {
    %c0 = arith.constant 0 : index
    %c0_0 = arith.constant 0 : index
    %0 = vector.load %arg1[%c0, %c0_0] : memref<8x128xf32, #tpu.memory_space<vmem>>, vector<8x128xf32>
    %c0_1 = arith.constant 0 : index
    %c0_2 = arith.constant 0 : index
    %1 = vector.load %arg2[%c0_1, %c0_2] : memref<56x8xf32, #tpu.memory_space<vmem>>, vector<56x8xf32>
    %cst = arith.constant dense<0.000000e+00> : vector<56x128xf32>
    %2 = tpu.matmul %1, %0, %cst {dimension_numbers = #tpu.dot_dimension_numbers<[1], [0], [0], [1], [0, 0, 1, 1], [], []>} : vector<56x8xf32>, vector<8x128xf32>, vector<56x128xf32> -> vector<56x128xf32>
    %c0_3 = arith.constant 0 : index
    %c0_4 = arith.constant 0 : index
    %3 = vector.load %arg3[%c0_3, %c0_4] : memref<56x1xf32, #tpu.memory_space<vmem>>, vector<56x1xf32>
    %4 = vector.broadcast %3 : vector<56x1xf32> to vector<56x128xf32>
    %5 = arith.addf %2, %4 : vector<56x128xf32>
    %6 = math.tanh %5 : vector<56x128xf32>
    %c0_5 = arith.constant 0 : index
    %c0_6 = arith.constant 0 : index
    %7 = vector.load %arg4[%c0_5, %c0_6] : memref<56x56xf32, #tpu.memory_space<vmem>>, vector<56x56xf32>
    %cst_7 = arith.constant dense<0.000000e+00> : vector<56x128xf32>
    %8 = tpu.matmul %7, %6, %cst_7 {dimension_numbers = #tpu.dot_dimension_numbers<[1], [0], [0], [1], [0, 0, 1, 1], [], []>} : vector<56x56xf32>, vector<56x128xf32>, vector<56x128xf32> -> vector<56x128xf32>
    %c0_8 = arith.constant 0 : index
    %c0_9 = arith.constant 0 : index
    %9 = vector.load %arg5[%c0_8, %c0_9] : memref<56x1xf32, #tpu.memory_space<vmem>>, vector<56x1xf32>
    %10 = vector.broadcast %9 : vector<56x1xf32> to vector<56x128xf32>
    %11 = arith.addf %8, %10 : vector<56x128xf32>
    %12 = math.tanh %11 : vector<56x128xf32>
    %c0_10 = arith.constant 0 : index
    %c0_11 = arith.constant 0 : index
    %13 = vector.load %arg6[%c0_10, %c0_11] : memref<8x56xf32, #tpu.memory_space<vmem>>, vector<8x56xf32>
    %cst_12 = arith.constant dense<0.000000e+00> : vector<8x128xf32>
    %14 = tpu.matmul %13, %12, %cst_12 {dimension_numbers = #tpu.dot_dimension_numbers<[1], [0], [0], [1], [0, 0, 1, 1], [], []>} : vector<8x56xf32>, vector<56x128xf32>, vector<8x128xf32> -> vector<8x128xf32>
    %c0_13 = arith.constant 0 : index
    %c0_14 = arith.constant 0 : index
    %15 = vector.load %arg7[%c0_13, %c0_14] : memref<8x1xf32, #tpu.memory_space<vmem>>, vector<8x1xf32>
    %16 = vector.broadcast %15 : vector<8x1xf32> to vector<8x128xf32>
    %17 = arith.addf %14, %16 : vector<8x128xf32>
    %c0_15 = arith.constant 0 : index
    %c0_16 = arith.constant 0 : index
    %18 = vector.load %arg8[%c0_15, %c0_16] : memref<8x128xf32, #tpu.memory_space<vmem>>, vector<8x128xf32>
    tpu.vector_store %arg8[%c0_15, %c0_16], %17 {strides = array<i32>} : memref<8x128xf32, #tpu.memory_space<vmem>>, vector<8x128xf32>,
    return
  }
  func.func @transform_0(%arg0: i32) -> (i32, i32) {
    %c0_i32 = arith.constant 0 : i32
    %c0_i32_0 = arith.constant 0 : i32
    return %c0_i32, %arg0 : i32, i32
  }
  func.func @transform_1(%arg0: i32) -> (i32, i32) {
    %c0_i32 = arith.constant 0 : i32
    %c0_i32_0 = arith.constant 0 : i32
    %c0_i32_1 = arith.constant 0 : i32
    return %c0_i32, %c0_i32_0 : i32, i32
  }
  func.func @transform_2(%arg0: i32) -> (i32, i32) {
    %c0_i32 = arith.constant 0 : i32
    %c0_i32_0 = arith.constant 0 : i32
    %c0_i32_1 = arith.constant 0 : i32
    return %c0_i32, %c0_i32_0 : i32, i32
  }
  func.func @transform_3(%arg0: i32) -> (i32, i32) {
    %c0_i32 = arith.constant 0 : i32
    %c0_i32_0 = arith.constant 0 : i32
    %c0_i32_1 = arith.constant 0 : i32
    return %c0_i32, %c0_i32_0 : i32, i32
  }
  func.func @transform_4(%arg0: i32) -> (i32, i32) {
    %c0_i32 = arith.constant 0 : i32
    %c0_i32_0 = arith.constant 0 : i32
    %c0_i32_1 = arith.constant 0 : i32
    return %c0_i32, %c0_i32_0 : i32, i32
  }
  func.func @transform_5(%arg0: i32) -> (i32, i32) {
    %c0_i32 = arith.constant 0 : i32
    %c0_i32_0 = arith.constant 0 : i32
    %c0_i32_1 = arith.constant 0 : i32
    return %c0_i32, %c0_i32_0 : i32, i32
  }
  func.func @transform_6(%arg0: i32) -> (i32, i32) {
    %c0_i32 = arith.constant 0 : i32
    %c0_i32_0 = arith.constant 0 : i32
    %c0_i32_1 = arith.constant 0 : i32
    return %c0_i32, %c0_i32_0 : i32, i32
  }
  func.func @transform_7(%arg0: i32) -> (i32, i32) {
    %c0_i32 = arith.constant 0 : i32
    %c0_i32_0 = arith.constant 0 : i32
    return %c0_i32, %arg0 : i32, i32
  }
}

</mosaic_0001>

<bundles_post_ra>
// kernel: sampler_forward_pallas.1
= control target key start
LH: loop header
LB: loop body
LE: loop exit
PB: predicated region body
PF: predicated region fallthrough
CT: control target
= control target key end

     0   :  { %12 = vsyncpa [#allocation3], 0  ;;  %s1359_s0 = inlined_call_operand.vmem [shape: f32[8,256], index: 0, kind: input, shape index: {}]   ;;  %s1360_s1 = inlined_call_operand.vmem [shape: f32[56,8], index: 1, kind: input, shape index: {}]   ;;  %s1361_s2 = inlined_call_operand.vmem [shape: f32[56,1], index: 2, kind: input, shape index: {}]   ;;  %s1362_s3 = inlined_call_operand.vmem [shape: f32[56,56], index: 3, kind: input, shape index: {}]   ;;  %s1363_s4 = inlined_call_operand.vmem [shape: f32[56,1], index: 4, kind: input, shape index: {}]   ;;  %s1364_s5 = inlined_call_operand.vmem [shape: f32[8,56], index: 5, kind: input, shape index: {}]   ;;  %s1365_s6 = inlined_call_operand.vmem [shape: f32[8,1], index: 6, kind: input, shape index: {}]   ;;  %s1366_s7 = inlined_call_operand.hbm [shape: f32[8,256], index: 7, kind: output, shape index: {}]  }
   0x1   :  { %14 = vsyncpa [#allocation3 + $0x1], 0  ;;  %s1115_s24 = smov 0   ;;  %s1117_s25 = smov 0  }
   0x2   :  { %s1119_s26 = smov 0   ;;  %s1121_s27 = smov 0  }
   0x3 LB: > { %s1136_s28 = sadd.s32 4294967295, %s1068_s27   ;;  %s785_s29 = sadd.s32 4294967294, %s1068_s27   ;;  %s1068_s27 = sphi %s1121_s27, %s1372_s27   ;;  %s1064_s26 = sphi %s1119_s26, %s1371_s26   ;;  %s1060_s25 = sphi %s1117_s25, %s1370_s25   ;;  %s1056_s24 = sphi %s1115_s24, %s1369_s24  }
   0x4   : > { %s1140_s30 = sadd.s32 1, %s1068_s27   ;;  %s179_s8 = sadd.s32 1, %s1064_s26 }
   0x5   : > { %s176_s9 = ssub.s32 %s1068_s27, %s1140_s30  ;;  %p189_p0 = scmp.ne.s32.totalorder %s1064_s26, %s1060_s25 }
   0x6   : > { %p177_p1 = scmp.eq.s32.totalorder %s176_s9, 0  ;;  %p190_p2 = scmp.eq.s32.totalorder %s1136_s28, 1 }
   0x7   : > { %p195_p3 = scmp.ne.s32.totalorder %s1060_s25, %s1056_s24  ;;  %p196_p4 = scmp.eq.s32.totalorder %s785_s29, 1 }
   0x8   : > { %s1151_s10 = scalar_select %p177_p1, %s1064_s26, %s179_s8  }
   0x9   : > { %p1153_p5 = por %p190_p2, %p189_p0  ;;  %p1157_p6 = por %p196_p4, %p195_p3 }
   0xa   : > { %p788_p7 = scmp.ge.s32.totalorder %s1068_s27, 1  ;;  %p239_p8 = scmp.lt.s32.totalorder %s1068_s27, 3 }
   0xc   : > { %p240_p9 = pnand %p788_p7, %p239_p8 }
   0xd   : > { %p270_p10 = scmp.lt.s32.totalorder (!%p240_p9), %s1136_s28, 1  ;;  %v1070_v0 = vmov (!%p240_p9), 0.0   ;;  %vm1071_vm0 = vmmov (!%p240_p9), 0   ;;  %v1072_v1 = vmov (!%p240_p9), 0   ;;  %v282_v2 = vld [vmem:[%s1361_s2] sm:$0xff] (!%p240_p9)  ;;  %v284_v3 = vld [vmem:[%s1361_s2 + $0x10] sm:$0xff] (!%p240_p9) }
   0xe   : > { %243 = sbr.rel (%p240_p9) target bundleno = 759 (0x2f7), region = 48  ;;  %840 = vmatprep.subr.mxu0 (!%p240_p9), %v1070_v0  ;;  %842 = vmatprep.mubr.msk.f32.mxu0 (!%p240_p9), %vm1071_vm0, %v1070_v0  ;;  %v283_v4 = vld [vmem:[%s1361_s2 + $0x8] sm:$0xff] (!%p240_p9)  ;;  %v275_v5 = vld [vmem:[%s1360_s1] sm:$0xff] (!%p240_p9)  ;;  %vm324_vm1 = vcmask (!%p240_p9), 64512   ;;  %v285_v6 = vld [vmem:[%s1361_s2 + $0x18] sm:$0xff] (!%p240_p9)  ;;  %v1073_v25 = vmov (!%p240_p9), 0.0|0.0  }
   0xf   : > { %976 = vset.pattern.permute.xlu0 (!%p240_p9), %v1072_v1  ;;  %977 = vset.pattern.permute.xlu1 (!%p240_p9), %v1072_v1  ;;  %v286_v8 = vld [vmem:[%s1361_s2 + $0x20] sm:$0xff] (!%p240_p9)  ;;  %v276_v9 = vld [vmem:[%s1360_s1 + $0x8] sm:$0xff] (!%p240_p9)  ;;  %v288_v11 = vld [vmem:[%s1361_s2 + $0x30] sm:$0xff] (!%p240_p9)  ;;  %vm502_vm2 = vcmask (!%p240_p9), 457728   ;;  %s267_s22 = sand.u32 (!%p240_p9), 1, %s1060_s25   ;;  %s807_s29 = sshll.u32 (!%p240_p9), %s1136_s28, 7 }
  0x10   : > { %291 = vperm.xlu0 (!%p240_p9), %976, %v282_v2   ;;  %877 = vmatprep.mubr.msk.f32.mxu1 (!%p240_p9), %vm1071_vm0, %v1070_v0  ;;  %v287_v10 = vld [vmem:[%s1361_s2 + $0x28] sm:$0xff] (!%p240_p9)  ;;  %v277_v12 = vld [vmem:[%s1360_s1 + $0x10] sm:$0xff] (!%p240_p9)  ;;  %v460_v13 = vld [vmem:[%s1363_s4] sm:$0xff] (!%p240_p9)  ;;  %s1317_s15 = scalar_lea.hbm (!%p240_p9), %s1366_s7, %s807_s29  ;;  %s713_s16 = scalar_lea.sflag (!%p240_p9), [#allocation3], %s267_s22 }
  0x11   : > { %301 = vperm.xlu1 (!%p240_p9), %977, %v284_v3   ;;  %v461_v14 = vld [vmem:[%s1363_s4 + $0x8] sm:$0xff] (!%p240_p9)  ;;  %v278_v15 = vld [vmem:[%s1360_s1 + $0x18] sm:$0xff] (!%p240_p9)  ;;  %v462_v16 = vld [vmem:[%s1363_s4 + $0x10] sm:$0xff] (!%p240_p9)  ;;  %915 = vmatprep.subr.bf16.mxu1 (!%p240_p9), %v1073_v25 }
  0x12   : > { %v463_v17 = vld [vmem:[%s1363_s4 + $0x18] sm:$0xff] (!%p240_p9)  ;;  %v279_v18 = vld [vmem:[%s1360_s1 + $0x20] sm:$0xff] (!%p240_p9)  ;;  %v465_v20 = vld [vmem:[%s1363_s4 + $0x28] sm:$0xff] (!%p240_p9) }
  0x13   : > { %v464_v19 = vld [vmem:[%s1363_s4 + $0x20] sm:$0xff] (!%p240_p9)  ;;  %v280_v21 = vld [vmem:[%s1360_s1 + $0x28] sm:$0xff] (!%p240_p9)  ;;  %v466_v22 = vld [vmem:[%s1363_s4 + $0x30] sm:$0xff] (!%p240_p9) }
  0x14   : > { %296 = vperm.xlu0 (!%p240_p9), %976, %v283_v4   ;;  %v632_v23 = vld [vmem:[%s1365_s6] sm:$0xff] (!%p240_p9)  ;;  %v281_v24 = vld [vmem:[%s1360_s1 + $0x30] sm:$0xff] (!%p240_p9)  ;;  %v454_v2 = vld [vmem:[%s1362_s3 + $0x8] sm:$0xff] (!%p240_p9) }
  0x15   : > { %s271_s13 = scalar_select %p270_p10, %s1136_s28, 1  ;;  %306 = vperm.xlu1 %977, %v285_v6   ;;  %v453_v63 = vld [vmem:[%s1362_s3] sm:$0xff]  ;;  %v455_v3 = vld [vmem:[%s1362_s3 + $0x10] sm:$0xff]  ;;  %v456_v4 = vld [vmem:[%s1362_s3 + $0x18] sm:$0xff] }
  0x16   : > { %v458_v6 = vld [vmem:[%s1362_s3 + $0x28] sm:$0xff]  ;;  %s1074_s28 = smov [#allocation2]  }
  0x17   : > { %s790_s18 = sshll.u32 %s271_s13, 3 }
  0x18   : > { %s273_s23 = scalar_lea.vmem %s1359_s0, %s790_s18  ;;  %311 = vperm.xlu0 %976, %v286_v8   ;;  %s1010_s18 = sshll.u32 %s1074_s28, 4  ;;  %s1011_s18 = int_to_ptr.vmem [resolvable:$false] %s1010_s18 }
  0x19   : > { %v274_v7 = vld [vmem:[%s273_s23] sm:$0xff]  ;;  %316 = vperm.xlu1 %977, %v287_v10   ;;  %s789_s23 = sshll.u32 %s267_s22, 3  ;;  %s1012_s19 = scalar_lea.vmem %s1011_s18, 256 }
  0x1a   : > { %841 = vmatpush3.msra.mxu0 %v274_v7  ;;  %v459_v7 = vld [vmem:[%s1362_s3 + $0x30] sm:$0xff]  ;;  %s269_s8 = scalar_lea.vmem [#allocation2], %s789_s23 }
  0x1b   : > { %843 = vmatmul.mubr.msk.f32.vlgmr.msra.gmra.mrb[0].mxu0 %vm324_vm1, %v275_v5  ;;  %924 = vmatprep.subr.bf16.mxu0 %v1073_v25  ;;  %v457_v5 = vld [vmem:[%s1362_s3 + $0x20] sm:$0xff]  ;;  %s726_s9 = sshll.u32 %s269_s8, 4  ;;  %s1319_s9 = int_to_ptr.vmem [resolvable:$true] %s726_s9 }
  0x1c   : > { %845 = vmatprep.mubr.msk.f32.mxu0 %vm1071_vm0, %v1070_v0  ;;  %321 = vperm.xlu0 %976, %v288_v11   ;;  %s1006_s17 = scalar_lea.vmem %s1319_s9, 128  ;;  %p1013_p0 = scmp.lt.s32.totalorder %s1319_s9, %s1011_s18 }
  0x1d   : > { %469 = vperm.xlu1 %977, %v460_v13   ;;  %p1007_p11 = scmp.ne.s32.totalorder %s1319_s9, %s1006_s17  ;;  %p1014_p1 = scmp.lt.s32.totalorder %s1012_s19, %s1006_s17 }
  0x1f   : > { %846 = vmatmul.mubr.msk.f32.gmra.mrb[2].mxu0 %vm324_vm1, %v276_v9  ;;  %p1008_p12 = pnand %p1007_p11, %p1153_p5  ;;  %p1015_p2 = por %p1014_p1, %p1013_p0 }
  0x20   : > { %848 = vmatprep.mubr.msk.f32.mxu0 %vm1071_vm0, %v1070_v0  ;;  %474 = vperm.xlu0 %976, %v461_v14  }
  0x21   : > { %479 = vperm.xlu1 %977, %v462_v16   ;;  %p1009_p13 = pneg %p1008_p12 }
  0x23   : > { %849 = vmatmul.mubr.msk.f32.gmra.mrb[4].mxu0 %vm324_vm1, %v277_v12  ;;  %p1016_p3 = pnand %p1015_p2, %p1009_p13 }
  0x24   : > { %851 = vmatprep.mubr.msk.f32.mxu0 %vm1071_vm0, %v1070_v0  ;;  %484 = vperm.xlu0 %976, %v463_v17  }
  0x25   : > { %489 = vperm.xlu1 %977, %v464_v19  }
  0x27   : > { %852 = vmatmul.mubr.msk.f32.gmra.mrb[6].mxu0 %vm324_vm1, %v278_v15 }
  0x28   : > { %854 = vmatprep.mubr.msk.f32.mxu0 %vm1071_vm0, %v1070_v0  ;;  %494 = vperm.xlu0 %976, %v465_v20  }
  0x29   : > { %499 = vperm.xlu1 %977, %v466_v22  }
  0x2b   : > { %855 = vmatmul.mubr.msk.f32.gmra.mrb[8].mxu0 %vm324_vm1, %v279_v18 }
  0x2c   : > { %857 = vmatprep.mubr.msk.f32.mxu0 %vm1071_vm0, %v1070_v0  ;;  %635 = vperm.xlu0 %976, %v632_v23  }
  0x2f   : > { %858 = vmatmul.mubr.msk.f32.gmra.mrb[10].mxu0 %vm324_vm1, %v280_v21 }
  0x30   : > { %860 = vmatprep.mubr.msk.f32.mxu0 %vm1071_vm0, %v1070_v0 }
  0x33   : > { %861 = vmatmul.mubr.msk.f32.gmra.mrb[12].mxu0 %vm324_vm1, %v281_v24 }
  0x34   : > { %912 = vmatprep.mubr.msk.f32.mxu0 %vm1071_vm0, %v1070_v0 }
  0x8f   : > { %v292_v26 = vpop.permute.xlu0 %291 }
  0x90   : > { %v302_v34 = vpop.permute.xlu1 %301 }
  0x93   : > { %v297_v30 = vpop.permute.xlu0 %296 }
  0x94   : > { %v307_v38 = vpop.permute.xlu1 %306 }
  0x97   : > { %v312_v45 = vpop.permute.xlu0 %311 }
  0x98   : > { %v317_v49 = vpop.permute.xlu1 %316 }
  0x9b   : > { %v322_v54 = vpop.permute.xlu0 %321 }
  0x9c   : > { %v470_v9 = vpop.permute.xlu1 %469 }
  0x9f   : > { %v475_v12 = vpop.permute.xlu0 %474 }
  0xa0   : > { %v480_v17 = vpop.permute.xlu1 %479 }
  0xa3   : > { %v485_v20 = vpop.permute.xlu0 %484 }
  0xee   : > { %v412_v27 = vpop.f32.mrb[0].mxu0 }
  0xef   : > { %v844_v28 = vpop.f32.mrb[1].mxu0  ;;  %v413_v29 = vadd.f32 %v412_v27, %v292_v26 }
  0xf0   : > { %v490_v28 = vpop.permute.xlu1 %489 }
  0xf1   : > { %978 = vtanh.f32 %v413_v29 }
  0xf2   : > { %v417_v31 = vpop.f32.mrb[2].mxu0 }
  0xf3   : > { %v418_v32 = vadd.f32 %v417_v31, %v297_v30  ;;  %v847_v33 = vpop.f32.mrb[3].mxu0 }
  0xf5   : > { %980 = vtanh.f32 %v418_v32  ;;  %v495_v32 = vpop.permute.xlu0 %494 }
  0xf6   : > { %v422_v35 = vpop.f32.mrb[4].mxu0 }
  0xf7   : > { %v850_v36 = vpop.f32.mrb[5].mxu0  ;;  %v423_v37 = vadd.f32 %v422_v35, %v302_v34 }
  0xf9   : > { %982 = vtanh.f32 %v423_v37  ;;  %v500_v37 = vpop.permute.xlu1 %499 }
  0xfa   : > { %v427_v39 = vpop.f32.mrb[6].mxu0 }
  0xfb   : > { %v428_v40 = vadd.f32 %v427_v39, %v307_v38  ;;  %v853_v41 = vpop.f32.mrb[7].mxu0  ;;  %v979_v42 = vpop.eup %978 }
  0xfd   : > { %984 = vtanh.f32 %v428_v40 }
  0xfe   : > { %v432_v43 = vpop.f32.mrb[8].mxu0 }
  0xff   : > { %v981_v44 = vpop.eup %980  ;;  %v856_v46 = vpop.f32.mrb[9].mxu0  ;;  %v433_v47 = vadd.f32 %v432_v43, %v312_v45 }
 0x100   : > { %v916_v48 = vpack.c.bf16 %v981_v44, %v979_v42  ;;  %v631_v46 = vld [vmem:[%s1364_s5] sm:$0xff] }
 0x101   : > { %986 = vtanh.f32 %v433_v47 }
 0x102   : > { %v437_v50 = vpop.f32.mrb[10].mxu0  ;;  %917 = vmatpush3.bf16.msra.mxu1 %v916_v48 }
 0x103   : > { %v438_v51 = vadd.f32 %v437_v50, %v317_v49  ;;  %v859_v52 = vpop.f32.mrb[11].mxu0  ;;  %918 = vmatprep.subr.bf16.mxu1 %v1073_v25  ;;  %v983_v53 = vpop.eup %982 }
 0x105   : > { %988 = vtanh.f32 %v438_v51 }
 0x106   : > { %v442_v55 = vpop.f32.mrb[12].mxu0 }
 0x107   : > { %v985_v56 = vpop.eup %984  ;;  %v443_v57 = vadd.f32 %v442_v55, %v322_v54  ;;  %v862_v58 = vpop.f32.mrb[13].mxu0 }
 0x108   : > { %v919_v59 = vpack.c.bf16 %v985_v56, %v983_v53 }
 0x109   : > { %990 = vtanh.f32 %v443_v57 }
 0x10a   : > { %920 = vmatpush3.bf16.msra.mxu1 %v919_v59 }
 0x10b   : > { %921 = vmatprep.subr.bf16.mxu1 %v1073_v25  ;;  %v987_v60 = vpop.eup %986 }
 0x10f   : > { %v989_v61 = vpop.eup %988 }
 0x110   : > { %v922_v62 = vpack.c.bf16 %v989_v61, %v987_v60 }
 0x112   : > { %923 = vmatpush3.bf16.msra.mxu1 %v922_v62 }
 0x113   : > { %875 = vmatprep.subr.mxu1 %v1070_v0  ;;  %v991_v1 = vpop.eup %990 }
 0x116   : > { %876 = vmatpush3.msra.mxu1 %v991_v1 }
 0x117   : > { %878 = vmatmul.mubr.msk.f32.vlgmr.msra.gmra.mrb[0].mxu1 %vm502_vm2, %v453_v63 }
 0x118   : > { %880 = vmatprep.mubr.msk.f32.mxu1 %vm1071_vm0, %v1070_v0 }
 0x11b   : > { %881 = vmatmul.mubr.msk.f32.gmra.mrb[2].mxu1 %vm502_vm2, %v454_v2 }
 0x11c   : > { %883 = vmatprep.mubr.msk.f32.mxu1 %vm1071_vm0, %v1070_v0 }
 0x11f   : > { %884 = vmatmul.mubr.msk.f32.gmra.mrb[4].mxu1 %vm502_vm2, %v455_v3 }
 0x120   : > { %886 = vmatprep.mubr.msk.f32.mxu1 %vm1071_vm0, %v1070_v0 }
 0x123   : > { %887 = vmatmul.mubr.msk.f32.gmra.mrb[6].mxu1 %vm502_vm2, %v456_v4 }
 0x124   : > { %889 = vmatprep.mubr.msk.f32.mxu1 %vm1071_vm0, %v1070_v0 }
 0x127   : > { %890 = vmatmul.mubr.msk.f32.gmra.mrb[8].mxu1 %vm502_vm2, %v457_v5 }
 0x128   : > { %892 = vmatprep.mubr.msk.f32.mxu1 %vm1071_vm0, %v1070_v0 }
 0x12b   : > { %893 = vmatmul.mubr.msk.f32.gmra.mrb[10].mxu1 %vm502_vm2, %v458_v6 }
 0x12c   : > { %895 = vmatprep.mubr.msk.f32.mxu1 %vm1071_vm0, %v1070_v0 }
 0x12f   : > { %896 = vmatmul.mubr.msk.f32.gmra.mrb[12].mxu1 %vm502_vm2, %v459_v7 }
 0x1ea   : > { %v590_v8 = vpop.f32.mrb[0].mxu1 }
 0x1eb   : > { %v879_v10 = vpop.f32.mrb[1].mxu1  ;;  %v591_v11 = vadd.f32 %v590_v8, %v470_v9 }
 0x1ed   : > { %992 = vtanh.f32 %v591_v11 }
 0x1ee   : > { %v595_v13 = vpop.f32.mrb[2].mxu1 }
 0x1ef   : > { %v596_v14 = vadd.f32 %v595_v13, %v475_v12  ;;  %v882_v15 = vpop.f32.mrb[3].mxu1 }
 0x1f1   : > { %994 = vtanh.f32 %v596_v14 }
 0x1f2   : > { %v600_v16 = vpop.f32.mrb[4].mxu1 }
 0x1f3   : > { %v885_v18 = vpop.f32.mrb[5].mxu1  ;;  %v601_v19 = vadd.f32 %v600_v16, %v480_v17 }
 0x1f5   : > { %996 = vtanh.f32 %v601_v19 }
 0x1f6   : > { %v605_v21 = vpop.f32.mrb[6].mxu1 }
 0x1f7   : > { %v606_v22 = vadd.f32 %v605_v21, %v485_v20  ;;  %v888_v23 = vpop.f32.mrb[7].mxu1  ;;  %v993_v24 = vpop.eup %992 }
 0x1f9   : > { %998 = vtanh.f32 %v606_v22 }
 0x1fa   : > { %v610_v26 = vpop.f32.mrb[8].mxu1 }
 0x1fb   : > { %v995_v27 = vpop.eup %994  ;;  %v891_v29 = vpop.f32.mrb[9].mxu1  ;;  %v611_v30 = vadd.f32 %v610_v26, %v490_v28 }
 0x1fc   : > { %v925_v31 = vpack.c.bf16 %v995_v27, %v993_v24 }
 0x1fd   : > { %1000 = vtanh.f32 %v611_v30 }
 0x1fe   : > { %v615_v33 = vpop.f32.mrb[10].mxu1  ;;  %926 = vmatpush3.bf16.msra.mxu0 %v925_v31 }
 0x1ff   : > { %v616_v34 = vadd.f32 %v615_v33, %v495_v32  ;;  %v894_v35 = vpop.f32.mrb[11].mxu1  ;;  %927 = vmatprep.subr.bf16.mxu0 %v1073_v25  ;;  %v997_v36 = vpop.eup %996 }
 0x201   : > { %1002 = vtanh.f32 %v616_v34 }
 0x202   : > { %v620_v38 = vpop.f32.mrb[12].mxu1 }
 0x203   : > { %v999_v39 = vpop.eup %998  ;;  %v621_v40 = vadd.f32 %v620_v38, %v500_v37  ;;  %v897_v41 = vpop.f32.mrb[13].mxu1 }
 0x204   : > { %v928_v42 = vpack.c.bf16 %v999_v39, %v997_v36 }
 0x205   : > { %1004 = vtanh.f32 %v621_v40 }
 0x206   : > { %929 = vmatpush3.bf16.msra.mxu0 %v928_v42 }
 0x207   : > { %930 = vmatprep.subr.bf16.mxu0 %v1073_v25  ;;  %v1001_v43 = vpop.eup %1000  ;;  %v636_v25 = vpop.permute.xlu0 %635 }
 0x20b   : > { %v1003_v44 = vpop.eup %1002 }
 0x20c   : > { %v931_v45 = vpack.c.bf16 %v1003_v44, %v1001_v43 }
 0x20e   : > { %932 = vmatpush3.bf16.msra.mxu0 %v931_v45 }
 0x20f   : > { %910 = vmatprep.subr.mxu0 %v1070_v0  ;;  %v1005_v47 = vpop.eup %1004 }
 0x212   : > { %911 = vmatpush3.msra.mxu0 %v1005_v47 }
 0x213   : > { %913 = vmatmul.mubr.msk.f32.vlgmr.msra.gmra.mrb[14].mxu0 %vm502_vm2, %v631_v46 }
 0x2e6   : > { %v707_v48 = vpop.f32.mrb[14].mxu0 }
 0x2e7   : > { %v708_v49 = vadd.f32 %v707_v48, %v636_v25  ;;  %v914_v50 = vpop.f32.mrb[15].mxu0 }
 0x2e9   : > { %711 = vst [vmem:[%s269_s8] sm:$0xff] %v708_v49 }
 0x2ea   : > { %1019 = shalt.err (!%p1016_p3)
}
 0x2eb   : > { %s1020_s20 = scalar_lea.hbm %s1317_s15, 128  ;;  %s1024_s23 = scalar_lea.hbm %s1366_s7, 256 }
 0x2ec   : > { %p1021_p4 = scmp.ne.s32.totalorder %s1317_s15, %s1020_s20  ;;  %p1025_p9 = scmp.lt.u32.totalorder %s1317_s15, %s1366_s7 }
 0x2ed   : > { %p1026_p10 = scmp.lt.u32.totalorder %s1024_s23, %s1020_s20  ;;  %p1028_p12 = scmp.lt.u32.totalorder %s1020_s20, %s1317_s15 }
 0x2ee   : > { %p1022_p7 = pnand %p1021_p4, %p1153_p5 }
 0x2ef   : > { %p1027_p11 = por %p1026_p10, %p1025_p9 }
 0x2f0   : > { %p1023_p8 = pneg %p1022_p7 }
 0x2f1   : > { %p1029_p13 = por %p1028_p12, %p1027_p11 }
 0x2f3   : > { %p1030_p0 = pnand %p1029_p13, %p1023_p8 }
 0x2f5   : > { %1033 = shalt.err (!%p1030_p0)
}
 0x2f6   : > { %933 = dma.vmem_to_hbm [thread:$0]  (%p1153_p5), %s1319_s9, 128, %s1317_s15, %s713_s16  }
 0x2f7 PF: > { %p939_p1 = scmp.ge.s32.totalorder %s1068_s27, 2  ;;  %s738_s14 = sand.u32 1, %s1056_s24  }
 0x2f8   : > { %s739_s13 = scalar_lea.sflag [#allocation3], %s738_s14 }
 0x2f9   : > { %p936_p2 = pnand %p939_p1, %p1157_p6 }
 0x2fb   : > { %1051 = dma.done.wait (!%p936_p2), %s739_s13, 128  }
 0x2fc   : > { %1053 = vsyncadd (!%p936_p2), %s739_s13, 4294967168  ;;  %p17_p3 = scmp.ge.s32.totalorder %s1140_s30, 4   ;;  %s1369_s24 = smov %s1060_s25 }
 0x2fd   : > { %s1370_s25 = smov %s1064_s26  ;;  %s1371_s26 = smov %s1151_s10 }
 0x2fe   : > { %s1372_s27 = smov %s1140_s30  ;;  %19 = sbr.rel (!%p17_p3) target bundleno = 3 (0x3), region = 83 }
 0x305   :  { %744 = vsyncpa [#allocation3], 1 }
 0x306   :  { %746 = vsyncpa [#allocation3 + $0x1], 1 }

</bundles_post_ra>
